<compile_context>
chip_gen: v6e
topology: v6e:2x2x1
jax: 0.10.0
libtpu: 0.0.40
codegen_flags: <defaults>
</compile_context>

<pallas_src>
import jax
import jax.numpy as jnp
from jax.experimental import pallas as pl
from jax.experimental.pallas import tpu as pltpu


# ----------------------------- Pallas kernels ------------------------------

def _mac_conv1x1(w, b, x):
    """1x1 conv as unrolled VPU broadcast-MACs (skips the MXU).

    w: (Cout, Cin), b: (Cout, 1), x: (Cin, T)  ->  (Cout, T)
    """
    cin = w.shape[1]
    y = b + w[:, 0:1] * x[0:1, :]
    for i in range(1, cin):
        y = y + w[:, i:i + 1] * x[i:i + 1, :]
    return y


def _leaky(x, slope=0.1):
    return jnp.where(x >= 0.0, x, slope * x)


def _freq_fuse_kernel(re_ref, im_ref, ph_ref,
                      aw1_ref, ab1_ref, aw2_ref, ab2_ref,
                      pw1_ref, pb1_ref, pw2_ref, pb2_ref,
                      mag_ref, pha_ref):
    """Fused: fft-magnitude + amp_fuse chain + pha_fuse chain on one (C,T) tile."""
    re = re_ref[0]                       # (C, T)
    im = im_ref[0]
    ph = ph_ref[0]

    mag = jnp.sqrt(re * re + im * im)    # torch.abs(fft_x)

    m = _leaky(_mac_conv1x1(aw1_ref[...], ab1_ref[...], mag))
    mag_ref[0] = _mac_conv1x1(aw2_ref[...], ab2_ref[...], m)

    p = _leaky(_mac_conv1x1(pw1_ref[...], pb1_ref[...], ph))
    pha_ref[0] = _mac_conv1x1(pw2_ref[...], pb2_ref[...], p)


def _post_kernel(re_ref, im_ref, invd_ref, w_ref, b_ref, o_ref):
    """Fused: |ifft| crop, * 1/d_map, post 1x1 conv on one (C,T) tile."""
    re = re_ref[0]
    im = im_ref[0]
    crop = jnp.sqrt(re * re + im * im) * invd_ref[...]   # (C,T) * (1,T)
    o_ref[0] = _mac_conv1x1(w_ref[...], b_ref[...], crop)


# --------------------------- pallas_call wrappers ---------------------------

def _pick_tile(hw, c):
    """Largest lane-dense tile (multiple of 128) dividing hw, with its (C, T)
    block capped at ~1 MiB; fall back to the full extent when hw % 128 != 0."""
    if hw % 128 != 0:
        return hw                                  # full-extent block is legal
    budget = (1 << 20) // (4 * max(int(c), 1))     # ~1 MiB per (C, T) f32 block
    cap = max(128, min(hw, (budget // 128) * 128, 8192))
    best, t = 128, 128
    while t <= cap:
        if hw % t == 0:
            best = t
        t += 128
    return best


def _common_specs(N, C, HW):
    T = _pick_tile(HW, C)
    grid = (N, HW // T)
    x_spec = pl.BlockSpec((1, C, T), lambda n, t: (n, 0, t))
    w_spec = pl.BlockSpec((C, C), lambda n, t: (0, 0))
    b_spec = pl.BlockSpec((C, 1), lambda n, t: (0, 0))
    d_spec = pl.BlockSpec((1, T), lambda n, t: (0, t))
    return grid, x_spec, w_spec, b_spec, d_spec


def freq_fuse(re, im, ph, p):
    """Kernel A: magnitude + amp_fuse / pha_fuse conv chains, one fused pass."""
    N, C, HW = re.shape
    grid, x_spec, w_spec, b_spec, _ = _common_specs(N, C, HW)
    mag, pha = pl.pallas_call(
        _freq_fuse_kernel,
        grid=grid,
        in_specs=[x_spec, x_spec, x_spec,
                  w_spec, b_spec, w_spec, b_spec,
                  w_spec, b_spec, w_spec, b_spec],
        out_specs=[x_spec, x_spec],
        out_shape=[jax.ShapeDtypeStruct((N, C, HW), jnp.float32)] * 2,
        compiler_params=pltpu.CompilerParams(
            dimension_semantics=("parallel", "parallel")),
    )(re, im, ph,
      p["amp_w1"], p["amp_b1"], p["amp_w2"], p["amp_b2"],
      p["pha_w1"], p["pha_b1"], p["pha_w2"], p["pha_b2"])
    return mag, pha


def post_fuse(cre, cim, inv_d, p):
    """Kernel B: |ifft| + *1/d_map + post 1x1 conv, one fused pass."""
    N, C, HW = cre.shape
    grid, x_spec, w_spec, b_spec, d_spec = _common_specs(N, C, HW)
    return pl.pallas_call(
        _post_kernel,
        grid=grid,
        in_specs=[x_spec, x_spec, d_spec, w_spec, b_spec],
        out_specs=x_spec,
        out_shape=jax.ShapeDtypeStruct((N, C, HW), jnp.float32),
        compiler_params=pltpu.CompilerParams(
            dimension_semantics=("parallel", "parallel")),
    )(cre, cim, inv_d, p["post_w"], p["post_b"])


# ------------------------------ XLA-side glue -------------------------------

def _repeat2x2(x):
    """repeat_interleave(2, dim=2).repeat_interleave(2, dim=3) == nearest x2."""
    N, C, H, W = x.shape
    y = jnp.broadcast_to(x[:, :, :, None, :, None], (N, C, H, 2, W, 2))
    return y.reshape(N, C, 2 * H, 2 * W)


def _calc_d_map(H, W):
    """get_D_map_optimized: |1 + e^{i*pi*i/H} + e^{i*pi*j/W} + e^{i*pi*(i/H+j/W)}|/4."""
    ii = jnp.arange(H, dtype=jnp.float32).reshape(H, 1)
    jj = jnp.arange(W, dtype=jnp.float32).reshape(1, W)
    t2 = jnp.exp(1j * jnp.pi * ii / H)
    t3 = jnp.exp(1j * jnp.pi * jj / W)
    res = 1.0 + t2 + t3 + t2 * t3
    return (jnp.abs(res) / 4.0).astype(jnp.float32)


def freup_areadinterpolation_v2(x, params):
    """x: (N, C, H, W) float32 -> (N, C, 2H, 2W) float32."""
    N, C, H, W = x.shape
    HW = H * W

    # FFT of the input.  TODO(synk): no Pallas FFT primitive; kept in XLA.
    fx = jnp.fft.fft2(x)
    re = jnp.real(fx).reshape(N, C, HW)
    im = jnp.imag(fx).reshape(N, C, HW)
    # TODO(synk): atan2 kept in XLA (fuses with the real/imag extraction).
    ph = jnp.angle(fx).reshape(N, C, HW)

    # Pallas kernel A: fft-magnitude + amp_fuse / pha_fuse conv chains.
    Mag, Pha = freq_fuse(re, im, ph, params)
    Mag = Mag.reshape(N, C, H, W)
    Pha = Pha.reshape(N, C, H, W)

    # cos/sin + the 2x2 repeat_interleave stay in XLA: they fuse into the
    # (N, C, 2H, 2W) ifft-input materialization that is required anyway.
    real = Mag * jnp.cos(Pha)
    imag = Mag * jnp.sin(Pha)
    spec = jax.lax.complex(_repeat2x2(real), _repeat2x2(imag))

    output = jnp.fft.ifft2(spec)                          # (N, C, 2H, 2W) complex
    cre = jnp.real(output)[:, :, :H, :W].reshape(N, C, HW)
    cim = jnp.imag(output)[:, :, :H, :W].reshape(N, C, HW)

    # get_D_map_optimized depends only on (H, W); precompute its reciprocal.
    inv_d = (1.0 / _calc_d_map(H, W)).reshape(1, HW)

    # Pallas kernel B: |.| crop, * 1/d_map, post 1x1 conv.  The post conv is
    # applied at HxW; it commutes bit-exactly with the nearest x2 upsample.
    y = post_fuse(cre, cim, inv_d, params).reshape(N, C, H, W)

    # F.interpolate(crop, (2H, 2W)) with default mode='nearest'.
    return _repeat2x2(y)


# ----------------------- pure-jnp literal reference --------------------------

def _reference_forward(x, p):
    """Literal translation of the PyTorch forward (self-check only)."""
    N, C, H, W = x.shape
    fx = jnp.fft.fft2(x)
    mag = jnp.abs(fx)
    pha = jnp.angle(fx)

    def conv1x1(v, w, b):
        return jnp.einsum("oc,nchw->nohw", w, v,
                          precision=jax.lax.Precision.HIGHEST) + b.reshape(1, C, 1, 1)

    def chain(v, w1, b1, w2, b2):
        h = conv1x1(v, w1, b1)
        h = jnp.where(h >= 0, h, 0.1 * h)
        return conv1x1(h, w2, b2)

    Mag = chain(mag, p["amp_w1"], p["amp_b1"], p["amp_w2"], p["amp_b2"])
    Pha = chain(pha, p["pha_w1"], p["pha_b1"], p["pha_w2"], p["pha_b2"])
    amp_up = _repeat2x2(Mag)
    pha_up = _repeat2x2(Pha)
    out_c = jax.lax.complex(amp_up * jnp.cos(pha_up), amp_up * jnp.sin(pha_up))
    output = jnp.abs(jnp.fft.ifft2(out_c))
    d_map = _calc_d_map(H, W)[None, None]
    crop = output[:, :, :H, :W] / d_map
    up = _repeat2x2(crop)                 # F.interpolate default mode='nearest'
    return conv1x1(up, p["post_w"], p["post_b"])


# --------------------------- deterministic params ---------------------------

def init_params(key, channels):
    def conv_init(k):
        kw, kb = jax.random.split(k)
        w = jax.random.normal(kw, (channels, channels), jnp.float32) * 0.1
        b = jax.random.normal(kb, (channels, 1), jnp.float32) * 0.05
        return w, b

    ks = jax.random.split(key, 5)
    p = {}
    p["amp_w1"], p["amp_b1"] = conv_init(ks[0])
    p["amp_w2"], p["amp_b2"] = conv_init(ks[1])
    p["pha_w1"], p["pha_b1"] = conv_init(ks[2])
    p["pha_w2"], p["pha_b2"] = conv_init(ks[3])
    p["post_w"], p["post_b"] = conv_init(ks[4])
    return p


# --------------------------------- main --------------------------------------

if __name__ == "__main__":
    key = jax.random.PRNGKey(0)
    kx, kp = jax.random.split(key)
    N, C, H, W = 2, 4, 16, 16
    x = jax.random.uniform(kx, (N, C, H, W), jnp.float32)
    params = init_params(kp, C)

    fwd = jax.jit(freup_areadinterpolation_v2)
    out = jax.block_until_ready(fwd(x, params))

    assert out.shape == (N, C, 2 * H, 2 * W)
    assert bool(jnp.all(jnp.isfinite(out)))

    ref = _reference_forward(x, params)
    max_err = float(jnp.max(jnp.abs(out - ref)))
    assert bool(jnp.allclose(out, ref, rtol=1e-3, atol=1e-2)), max_err

    print("KERNEL_OK")
</pallas_src>

<mosaic_0001>
module attributes {stable_mosaic.version = 11 : i64} {
  func.func @_freq_fuse_kernel(%arg0: i32, %arg1: i32, %arg2: memref<1x4x256xf32, #tpu.memory_space<vmem>>, %arg3: memref<1x4x256xf32, #tpu.memory_space<vmem>>, %arg4: memref<1x4x256xf32, #tpu.memory_space<vmem>>, %arg5: memref<4x4xf32, #tpu.memory_space<vmem>>, %arg6: memref<4x1xf32, #tpu.memory_space<vmem>>, %arg7: memref<4x4xf32, #tpu.memory_space<vmem>>, %arg8: memref<4x1xf32, #tpu.memory_space<vmem>>, %arg9: memref<4x4xf32, #tpu.memory_space<vmem>>, %arg10: memref<4x1xf32, #tpu.memory_space<vmem>>, %arg11: memref<4x4xf32, #tpu.memory_space<vmem>>, %arg12: memref<4x1xf32, #tpu.memory_space<vmem>>, %arg13: memref<1x4x256xf32, #tpu.memory_space<vmem>>, %arg14: memref<1x4x256xf32, #tpu.memory_space<vmem>>) attributes {dimension_semantics = [#tpu.dimension_semantics<parallel>, #tpu.dimension_semantics<parallel>], iteration_bounds = array<i64: 2, 1>, scalar_prefetch = 0 : i64, scratch_operands = 0 : i64, tpu.core_type = #tpu.core_type<tc>, window_params = [{transform_indices = @transform_0, window_bounds = array<i64: 1, 4, 256>}, {transform_indices = @transform_1, window_bounds = array<i64: 1, 4, 256>}, {transform_indices = @transform_2, window_bounds = array<i64: 1, 4, 256>}, {pipeline_mode = #tpu.pipeline_mode<synchronous>, transform_indices = @transform_3, window_bounds = array<i64: 4, 4>}, {pipeline_mode = #tpu.pipeline_mode<synchronous>, transform_indices = @transform_4, window_bounds = array<i64: 4, 1>}, {pipeline_mode = #tpu.pipeline_mode<synchronous>, transform_indices = @transform_5, window_bounds = array<i64: 4, 4>}, {pipeline_mode = #tpu.pipeline_mode<synchronous>, transform_indices = @transform_6, window_bounds = array<i64: 4, 1>}, {pipeline_mode = #tpu.pipeline_mode<synchronous>, transform_indices = @transform_7, window_bounds = array<i64: 4, 4>}, {pipeline_mode = #tpu.pipeline_mode<synchronous>, transform_indices = @transform_8, window_bounds = array<i64: 4, 1>}, {pipeline_mode = #tpu.pipeline_mode<synchronous>, transform_indices = @transform_9, window_bounds = array<i64: 4, 4>}, {pipeline_mode = #tpu.pipeline_mode<synchronous>, transform_indices = @transform_10, window_bounds = array<i64: 4, 1>}, {transform_indices = @transform_11, window_bounds = array<i64: 1, 4, 256>}, {transform_indices = @transform_12, window_bounds = array<i64: 1, 4, 256>}]} {
    %c0 = arith.constant 0 : index
    %c0_0 = arith.constant 0 : index
    %c0_1 = arith.constant 0 : index
    %0 = vector.load %arg2[%c0, %c0_0, %c0_1] : memref<1x4x256xf32, #tpu.memory_space<vmem>>, vector<1x4x256xf32>
    %1 = vector.shape_cast %0 : vector<1x4x256xf32> to vector<4x256xf32>
    %c0_2 = arith.constant 0 : index
    %c0_3 = arith.constant 0 : index
    %c0_4 = arith.constant 0 : index
    %2 = vector.load %arg3[%c0_2, %c0_3, %c0_4] : memref<1x4x256xf32, #tpu.memory_space<vmem>>, vector<1x4x256xf32>
    %3 = vector.shape_cast %2 : vector<1x4x256xf32> to vector<4x256xf32>
    %c0_5 = arith.constant 0 : index
    %c0_6 = arith.constant 0 : index
    %c0_7 = arith.constant 0 : index
    %4 = vector.load %arg4[%c0_5, %c0_6, %c0_7] : memref<1x4x256xf32, #tpu.memory_space<vmem>>, vector<1x4x256xf32>
    %5 = vector.shape_cast %4 : vector<1x4x256xf32> to vector<4x256xf32>
    %6 = arith.mulf %1, %1 : vector<4x256xf32>
    %7 = arith.mulf %3, %3 : vector<4x256xf32>
    %8 = arith.addf %6, %7 : vector<4x256xf32>
    %9 = math.sqrt %8 : vector<4x256xf32>
    %c0_8 = arith.constant 0 : index
    %c0_9 = arith.constant 0 : index
    %10 = vector.load %arg5[%c0_8, %c0_9] : memref<4x4xf32, #tpu.memory_space<vmem>>, vector<4x4xf32>
    %c0_10 = arith.constant 0 : index
    %c0_11 = arith.constant 0 : index
    %11 = vector.load %arg6[%c0_10, %c0_11] : memref<4x1xf32, #tpu.memory_space<vmem>>, vector<4x1xf32>
    %12 = vector.extract_strided_slice %10 {offsets = [0, 0], sizes = [4, 1], strides = [1, 1]} : vector<4x4xf32> to vector<4x1xf32>
    %13 = vector.extract_strided_slice %9 {offsets = [0, 0], sizes = [1, 256], strides = [1, 1]} : vector<4x256xf32> to vector<1x256xf32>
    %14 = vector.broadcast %12 : vector<4x1xf32> to vector<4x256xf32>
    %15 = vector.broadcast %13 : vector<1x256xf32> to vector<4x256xf32>
    %16 = arith.mulf %14, %15 : vector<4x256xf32>
    %17 = vector.broadcast %11 : vector<4x1xf32> to vector<4x256xf32>
    %18 = arith.addf %17, %16 : vector<4x256xf32>
    %19 = vector.extract_strided_slice %10 {offsets = [0, 1], sizes = [4, 1], strides = [1, 1]} : vector<4x4xf32> to vector<4x1xf32>
    %20 = vector.extract_strided_slice %9 {offsets = [1, 0], sizes = [1, 256], strides = [1, 1]} : vector<4x256xf32> to vector<1x256xf32>
    %21 = vector.broadcast %19 : vector<4x1xf32> to vector<4x256xf32>
    %22 = vector.broadcast %20 : vector<1x256xf32> to vector<4x256xf32>
    %23 = arith.mulf %21, %22 : vector<4x256xf32>
    %24 = arith.addf %18, %23 : vector<4x256xf32>
    %25 = vector.extract_strided_slice %10 {offsets = [0, 2], sizes = [4, 1], strides = [1, 1]} : vector<4x4xf32> to vector<4x1xf32>
    %26 = vector.extract_strided_slice %9 {offsets = [2, 0], sizes = [1, 256], strides = [1, 1]} : vector<4x256xf32> to vector<1x256xf32>
    %27 = vector.broadcast %25 : vector<4x1xf32> to vector<4x256xf32>
    %28 = vector.broadcast %26 : vector<1x256xf32> to vector<4x256xf32>
    %29 = arith.mulf %27, %28 : vector<4x256xf32>
    %30 = arith.addf %24, %29 : vector<4x256xf32>
    %31 = vector.extract_strided_slice %10 {offsets = [0, 3], sizes = [4, 1], strides = [1, 1]} : vector<4x4xf32> to vector<4x1xf32>
    %32 = vector.extract_strided_slice %9 {offsets = [3, 0], sizes = [1, 256], strides = [1, 1]} : vector<4x256xf32> to vector<1x256xf32>
    %33 = vector.broadcast %31 : vector<4x1xf32> to vector<4x256xf32>
    %34 = vector.broadcast %32 : vector<1x256xf32> to vector<4x256xf32>
    %35 = arith.mulf %33, %34 : vector<4x256xf32>
    %36 = arith.addf %30, %35 : vector<4x256xf32>
    %cst = arith.constant 0.000000e+00 : f32
    %37 = vector.broadcast %cst : f32 to vector<4x256xf32>
    %38 = arith.cmpf oge, %36, %37 : vector<4x256xf32>
    %cst_12 = arith.constant 1.000000e-01 : f32
    %39 = vector.broadcast %cst_12 : f32 to vector<4x256xf32>
    %40 = arith.mulf %39, %36 : vector<4x256xf32>
    %41 = arith.select %38, %36, %40 : vector<4x256xi1>, vector<4x256xf32>
    %c0_13 = arith.constant 0 : index
    %c0_14 = arith.constant 0 : index
    %42 = vector.load %arg7[%c0_13, %c0_14] : memref<4x4xf32, #tpu.memory_space<vmem>>, vector<4x4xf32>
    %c0_15 = arith.constant 0 : index
    %c0_16 = arith.constant 0 : index
    %43 = vector.load %arg8[%c0_15, %c0_16] : memref<4x1xf32, #tpu.memory_space<vmem>>, vector<4x1xf32>
    %44 = vector.extract_strided_slice %42 {offsets = [0, 0], sizes = [4, 1], strides = [1, 1]} : vector<4x4xf32> to vector<4x1xf32>
    %45 = vector.extract_strided_slice %41 {offsets = [0, 0], sizes = [1, 256], strides = [1, 1]} : vector<4x256xf32> to vector<1x256xf32>
    %46 = vector.broadcast %44 : vector<4x1xf32> to vector<4x256xf32>
    %47 = vector.broadcast %45 : vector<1x256xf32> to vector<4x256xf32>
    %48 = arith.mulf %46, %47 : vector<4x256xf32>
    %49 = vector.broadcast %43 : vector<4x1xf32> to vector<4x256xf32>
    %50 = arith.addf %49, %48 : vector<4x256xf32>
    %51 = vector.extract_strided_slice %42 {offsets = [0, 1], sizes = [4, 1], strides = [1, 1]} : vector<4x4xf32> to vector<4x1xf32>
    %52 = vector.extract_strided_slice %41 {offsets = [1, 0], sizes = [1, 256], strides = [1, 1]} : vector<4x256xf32> to vector<1x256xf32>
    %53 = vector.broadcast %51 : vector<4x1xf32> to vector<4x256xf32>
    %54 = vector.broadcast %52 : vector<1x256xf32> to vector<4x256xf32>
    %55 = arith.mulf %53, %54 : vector<4x256xf32>
    %56 = arith.addf %50, %55 : vector<4x256xf32>
    %57 = vector.extract_strided_slice %42 {offsets = [0, 2], sizes = [4, 1], strides = [1, 1]} : vector<4x4xf32> to vector<4x1xf32>
    %58 = vector.extract_strided_slice %41 {offsets = [2, 0], sizes = [1, 256], strides = [1, 1]} : vector<4x256xf32> to vector<1x256xf32>
    %59 = vector.broadcast %57 : vector<4x1xf32> to vector<4x256xf32>
    %60 = vector.broadcast %58 : vector<1x256xf32> to vector<4x256xf32>
    %61 = arith.mulf %59, %60 : vector<4x256xf32>
    %62 = arith.addf %56, %61 : vector<4x256xf32>
    %63 = vector.extract_strided_slice %42 {offsets = [0, 3], sizes = [4, 1], strides = [1, 1]} : vector<4x4xf32> to vector<4x1xf32>
    %64 = vector.extract_strided_slice %41 {offsets = [3, 0], sizes = [1, 256], strides = [1, 1]} : vector<4x256xf32> to vector<1x256xf32>
    %65 = vector.broadcast %63 : vector<4x1xf32> to vector<4x256xf32>
    %66 = vector.broadcast %64 : vector<1x256xf32> to vector<4x256xf32>
    %67 = arith.mulf %65, %66 : vector<4x256xf32>
    %68 = arith.addf %62, %67 : vector<4x256xf32>
    %c0_17 = arith.constant 0 : index
    %c0_18 = arith.constant 0 : index
    %c0_19 = arith.constant 0 : index
    %69 = vector.load %arg13[%c0_17, %c0_18, %c0_19] : memref<1x4x256xf32, #tpu.memory_space<vmem>>, vector<1x4x256xf32>
    %70 = vector.shape_cast %69 : vector<1x4x256xf32> to vector<4x256xf32>
    %71 = vector.shape_cast %68 : vector<4x256xf32> to vector<1x4x256xf32>
    tpu.vector_store %arg13[%c0_17, %c0_18, %c0_19], %71 {strides = array<i32>} : memref<1x4x256xf32, #tpu.memory_space<vmem>>, vector<1x4x256xf32>,
    %c0_20 = arith.constant 0 : index
    %c0_21 = arith.constant 0 : index
    %72 = vector.load %arg9[%c0_20, %c0_21] : memref<4x4xf32, #tpu.memory_space<vmem>>, vector<4x4xf32>
    %c0_22 = arith.constant 0 : index
    %c0_23 = arith.constant 0 : index
    %73 = vector.load %arg10[%c0_22, %c0_23] : memref<4x1xf32, #tpu.memory_space<vmem>>, vector<4x1xf32>
    %74 = vector.extract_strided_slice %72 {offsets = [0, 0], sizes = [4, 1], strides = [1, 1]} : vector<4x4xf32> to vector<4x1xf32>
    %75 = vector.extract_strided_slice %5 {offsets = [0, 0], sizes = [1, 256], strides = [1, 1]} : vector<4x256xf32> to vector<1x256xf32>
    %76 = vector.broadcast %74 : vector<4x1xf32> to vector<4x256xf32>
    %77 = vector.broadcast %75 : vector<1x256xf32> to vector<4x256xf32>
    %78 = arith.mulf %76, %77 : vector<4x256xf32>
    %79 = vector.broadcast %73 : vector<4x1xf32> to vector<4x256xf32>
    %80 = arith.addf %79, %78 : vector<4x256xf32>
    %81 = vector.extract_strided_slice %72 {offsets = [0, 1], sizes = [4, 1], strides = [1, 1]} : vector<4x4xf32> to vector<4x1xf32>
    %82 = vector.extract_strided_slice %5 {offsets = [1, 0], sizes = [1, 256], strides = [1, 1]} : vector<4x256xf32> to vector<1x256xf32>
    %83 = vector.broadcast %81 : vector<4x1xf32> to vector<4x256xf32>
    %84 = vector.broadcast %82 : vector<1x256xf32> to vector<4x256xf32>
    %85 = arith.mulf %83, %84 : vector<4x256xf32>
    %86 = arith.addf %80, %85 : vector<4x256xf32>
    %87 = vector.extract_strided_slice %72 {offsets = [0, 2], sizes = [4, 1], strides = [1, 1]} : vector<4x4xf32> to vector<4x1xf32>
    %88 = vector.extract_strided_slice %5 {offsets = [2, 0], sizes = [1, 256], strides = [1, 1]} : vector<4x256xf32> to vector<1x256xf32>
    %89 = vector.broadcast %87 : vector<4x1xf32> to vector<4x256xf32>
    %90 = vector.broadcast %88 : vector<1x256xf32> to vector<4x256xf32>
    %91 = arith.mulf %89, %90 : vector<4x256xf32>
    %92 = arith.addf %86, %91 : vector<4x256xf32>
    %93 = vector.extract_strided_slice %72 {offsets = [0, 3], sizes = [4, 1], strides = [1, 1]} : vector<4x4xf32> to vector<4x1xf32>
    %94 = vector.extract_strided_slice %5 {offsets = [3, 0], sizes = [1, 256], strides = [1, 1]} : vector<4x256xf32> to vector<1x256xf32>
    %95 = vector.broadcast %93 : vector<4x1xf32> to vector<4x256xf32>
    %96 = vector.broadcast %94 : vector<1x256xf32> to vector<4x256xf32>
    %97 = arith.mulf %95, %96 : vector<4x256xf32>
    %98 = arith.addf %92, %97 : vector<4x256xf32>
    %cst_24 = arith.constant 0.000000e+00 : f32
    %99 = vector.broadcast %cst_24 : f32 to vector<4x256xf32>
    %100 = arith.cmpf oge, %98, %99 : vector<4x256xf32>
    %cst_25 = arith.constant 1.000000e-01 : f32
    %101 = vector.broadcast %cst_25 : f32 to vector<4x256xf32>
    %102 = arith.mulf %101, %98 : vector<4x256xf32>
    %103 = arith.select %100, %98, %102 : vector<4x256xi1>, vector<4x256xf32>
    %c0_26 = arith.constant 0 : index
    %c0_27 = arith.constant 0 : index
    %104 = vector.load %arg11[%c0_26, %c0_27] : memref<4x4xf32, #tpu.memory_space<vmem>>, vector<4x4xf32>
    %c0_28 = arith.constant 0 : index
    %c0_29 = arith.constant 0 : index
    %105 = vector.load %arg12[%c0_28, %c0_29] : memref<4x1xf32, #tpu.memory_space<vmem>>, vector<4x1xf32>
    %106 = vector.extract_strided_slice %104 {offsets = [0, 0], sizes = [4, 1], strides = [1, 1]} : vector<4x4xf32> to vector<4x1xf32>
    %107 = vector.extract_strided_slice %103 {offsets = [0, 0], sizes = [1, 256], strides = [1, 1]} : vector<4x256xf32> to vector<1x256xf32>
    %108 = vector.broadcast %106 : vector<4x1xf32> to vector<4x256xf32>
    %109 = vector.broadcast %107 : vector<1x256xf32> to vector<4x256xf32>
    %110 = arith.mulf %108, %109 : vector<4x256xf32>
    %111 = vector.broadcast %105 : vector<4x1xf32> to vector<4x256xf32>
    %112 = arith.addf %111, %110 : vector<4x256xf32>
    %113 = vector.extract_strided_slice %104 {offsets = [0, 1], sizes = [4, 1], strides = [1, 1]} : vector<4x4xf32> to vector<4x1xf32>
    %114 = vector.extract_strided_slice %103 {offsets = [1, 0], sizes = [1, 256], strides = [1, 1]} : vector<4x256xf32> to vector<1x256xf32>
    %115 = vector.broadcast %113 : vector<4x1xf32> to vector<4x256xf32>
    %116 = vector.broadcast %114 : vector<1x256xf32> to vector<4x256xf32>
    %117 = arith.mulf %115, %116 : vector<4x256xf32>
    %118 = arith.addf %112, %117 : vector<4x256xf32>
    %119 = vector.extract_strided_slice %104 {offsets = [0, 2], sizes = [4, 1], strides = [1, 1]} : vector<4x4xf32> to vector<4x1xf32>
    %120 = vector.extract_strided_slice %103 {offsets = [2, 0], sizes = [1, 256], strides = [1, 1]} : vector<4x256xf32> to vector<1x256xf32>
    %121 = vector.broadcast %119 : vector<4x1xf32> to vector<4x256xf32>
    %122 = vector.broadcast %120 : vector<1x256xf32> to vector<4x256xf32>
    %123 = arith.mulf %121, %122 : vector<4x256xf32>
    %124 = arith.addf %118, %123 : vector<4x256xf32>
    %125 = vector.extract_strided_slice %104 {offsets = [0, 3], sizes = [4, 1], strides = [1, 1]} : vector<4x4xf32> to vector<4x1xf32>
    %126 = vector.extract_strided_slice %103 {offsets = [3, 0], sizes = [1, 256], strides = [1, 1]} : vector<4x256xf32> to vector<1x256xf32>
    %127 = vector.broadcast %125 : vector<4x1xf32> to vector<4x256xf32>
    %128 = vector.broadcast %126 : vector<1x256xf32> to vector<4x256xf32>
    %129 = arith.mulf %127, %128 : vector<4x256xf32>
    %130 = arith.addf %124, %129 : vector<4x256xf32>
    %c0_30 = arith.constant 0 : index
    %c0_31 = arith.constant 0 : index
    %c0_32 = arith.constant 0 : index
    %131 = vector.load %arg14[%c0_30, %c0_31, %c0_32] : memref<1x4x256xf32, #tpu.memory_space<vmem>>, vector<1x4x256xf32>
    %132 = vector.shape_cast %131 : vector<1x4x256xf32> to vector<4x256xf32>
    %133 = vector.shape_cast %130 : vector<4x256xf32> to vector<1x4x256xf32>
    tpu.vector_store %arg14[%c0_30, %c0_31, %c0_32], %133 {strides = array<i32>} : memref<1x4x256xf32, #tpu.memory_space<vmem>>, vector<1x4x256xf32>,
    return
  }
  func.func @transform_0(%arg0: i32, %arg1: i32) -> (i32, i32, i32) {
    %c0_i32 = arith.constant 0 : i32
    %c0_i32_0 = arith.constant 0 : i32
    return %arg0, %c0_i32, %arg1 : i32, i32, i32
  }
  func.func @transform_1(%arg0: i32, %arg1: i32) -> (i32, i32, i32) {
    %c0_i32 = arith.constant 0 : i32
    %c0_i32_0 = arith.constant 0 : i32
    return %arg0, %c0_i32, %arg1 : i32, i32, i32
  }
  func.func @transform_2(%arg0: i32, %arg1: i32) -> (i32, i32, i32) {
    %c0_i32 = arith.constant 0 : i32
    %c0_i32_0 = arith.constant 0 : i32
    return %arg0, %c0_i32, %arg1 : i32, i32, i32
  }
  func.func @transform_3(%arg0: i32, %arg1: i32) -> (i32, i32) {
    %c0_i32 = arith.constant 0 : i32
    %c0_i32_0 = arith.constant 0 : i32
    %c0_i32_1 = arith.constant 0 : i32
    return %c0_i32, %c0_i32_0 : i32, i32
  }
  func.func @transform_4(%arg0: i32, %arg1: i32) -> (i32, i32) {
    %c0_i32 = arith.constant 0 : i32
    %c0_i32_0 = arith.constant 0 : i32
    %c0_i32_1 = arith.constant 0 : i32
    return %c0_i32, %c0_i32_0 : i32, i32
  }
  func.func @transform_5(%arg0: i32, %arg1: i32) -> (i32, i32) {
    %c0_i32 = arith.constant 0 : i32
    %c0_i32_0 = arith.constant 0 : i32
    %c0_i32_1 = arith.constant 0 : i32
    return %c0_i32, %c0_i32_0 : i32, i32
  }
  func.func @transform_6(%arg0: i32, %arg1: i32) -> (i32, i32) {
    %c0_i32 = arith.constant 0 : i32
    %c0_i32_0 = arith.constant 0 : i32
    %c0_i32_1 = arith.constant 0 : i32
    return %c0_i32, %c0_i32_0 : i32, i32
  }
  func.func @transform_7(%arg0: i32, %arg1: i32) -> (i32, i32) {
    %c0_i32 = arith.constant 0 : i32
    %c0_i32_0 = arith.constant 0 : i32
    %c0_i32_1 = arith.constant 0 : i32
    return %c0_i32, %c0_i32_0 : i32, i32
  }
  func.func @transform_8(%arg0: i32, %arg1: i32) -> (i32, i32) {
    %c0_i32 = arith.constant 0 : i32
    %c0_i32_0 = arith.constant 0 : i32
    %c0_i32_1 = arith.constant 0 : i32
    return %c0_i32, %c0_i32_0 : i32, i32
  }
  func.func @transform_9(%arg0: i32, %arg1: i32) -> (i32, i32) {
    %c0_i32 = arith.constant 0 : i32
    %c0_i32_0 = arith.constant 0 : i32
    %c0_i32_1 = arith.constant 0 : i32
    return %c0_i32, %c0_i32_0 : i32, i32
  }
  func.func @transform_10(%arg0: i32, %arg1: i32) -> (i32, i32) {
    %c0_i32 = arith.constant 0 : i32
    %c0_i32_0 = arith.constant 0 : i32
    %c0_i32_1 = arith.constant 0 : i32
    return %c0_i32, %c0_i32_0 : i32, i32
  }
  func.func @transform_11(%arg0: i32, %arg1: i32) -> (i32, i32, i32) {
    %c0_i32 = arith.constant 0 : i32
    %c0_i32_0 = arith.constant 0 : i32
    return %arg0, %c0_i32, %arg1 : i32, i32, i32
  }
  func.func @transform_12(%arg0: i32, %arg1: i32) -> (i32, i32, i32) {
    %c0_i32 = arith.constant 0 : i32
    %c0_i32_0 = arith.constant 0 : i32
    return %arg0, %c0_i32, %arg1 : i32, i32, i32
  }
}

module attributes {stable_mosaic.version = 11 : i64} {
  func.func @_post_kernel(%arg0: i32, %arg1: i32, %arg2: memref<1x4x256xf32, #tpu.memory_space<vmem>>, %arg3: memref<1x4x256xf32, #tpu.memory_space<vmem>>, %arg4: memref<1x256xf32, #tpu.memory_space<vmem>>, %arg5: memref<4x4xf32, #tpu.memory_space<vmem>>, %arg6: memref<4x1xf32, #tpu.memory_space<vmem>>, %arg7: memref<1x4x256xf32, #tpu.memory_space<vmem>>) attributes {dimension_semantics = [#tpu.dimension_semantics<parallel>, #tpu.dimension_semantics<parallel>], iteration_bounds = array<i64: 2, 1>, scalar_prefetch = 0 : i64, scratch_operands = 0 : i64, tpu.core_type = #tpu.core_type<tc>, window_params = [{transform_indices = @transform_0, window_bounds = array<i64: 1, 4, 256>}, {transform_indices = @transform_1, window_bounds = array<i64: 1, 4, 256>}, {transform_indices = @transform_2, window_bounds = array<i64: 1, 256>}, {pipeline_mode = #tpu.pipeline_mode<synchronous>, transform_indices = @transform_3, window_bounds = array<i64: 4, 4>}, {pipeline_mode = #tpu.pipeline_mode<synchronous>, transform_indices = @transform_4, window_bounds = array<i64: 4, 1>}, {transform_indices = @transform_5, window_bounds = array<i64: 1, 4, 256>}]} {
    %c0 = arith.constant 0 : index
    %c0_0 = arith.constant 0 : index
    %c0_1 = arith.constant 0 : index
    %0 = vector.load %arg2[%c0, %c0_0, %c0_1] : memref<1x4x256xf32, #tpu.memory_space<vmem>>, vector<1x4x256xf32>
    %1 = vector.shape_cast %0 : vector<1x4x256xf32> to vector<4x256xf32>
    %c0_2 = arith.constant 0 : index
    %c0_3 = arith.constant 0 : index
    %c0_4 = arith.constant 0 : index
    %2 = vector.load %arg3[%c0_2, %c0_3, %c0_4] : memref<1x4x256xf32, #tpu.memory_space<vmem>>, vector<1x4x256xf32>
    %3 = vector.shape_cast %2 : vector<1x4x256xf32> to vector<4x256xf32>
    %4 = arith.mulf %1, %1 : vector<4x256xf32>
    %5 = arith.mulf %3, %3 : vector<4x256xf32>
    %6 = arith.addf %4, %5 : vector<4x256xf32>
    %7 = math.sqrt %6 : vector<4x256xf32>
    %c0_5 = arith.constant 0 : index
    %c0_6 = arith.constant 0 : index
    %8 = vector.load %arg4[%c0_5, %c0_6] : memref<1x256xf32, #tpu.memory_space<vmem>>, vector<1x256xf32>
    %9 = vector.broadcast %8 : vector<1x256xf32> to vector<4x256xf32>
    %10 = arith.mulf %7, %9 : vector<4x256xf32>
    %c0_7 = arith.constant 0 : index
    %c0_8 = arith.constant 0 : index
    %11 = vector.load %arg5[%c0_7, %c0_8] : memref<4x4xf32, #tpu.memory_space<vmem>>, vector<4x4xf32>
    %c0_9 = arith.constant 0 : index
    %c0_10 = arith.constant 0 : index
    %12 = vector.load %arg6[%c0_9, %c0_10] : memref<4x1xf32, #tpu.memory_space<vmem>>, vector<4x1xf32>
    %13 = vector.extract_strided_slice %11 {offsets = [0, 0], sizes = [4, 1], strides = [1, 1]} : vector<4x4xf32> to vector<4x1xf32>
    %14 = vector.extract_strided_slice %10 {offsets = [0, 0], sizes = [1, 256], strides = [1, 1]} : vector<4x256xf32> to vector<1x256xf32>
    %15 = vector.broadcast %13 : vector<4x1xf32> to vector<4x256xf32>
    %16 = vector.broadcast %14 : vector<1x256xf32> to vector<4x256xf32>
    %17 = arith.mulf %15, %16 : vector<4x256xf32>
    %18 = vector.broadcast %12 : vector<4x1xf32> to vector<4x256xf32>
    %19 = arith.addf %18, %17 : vector<4x256xf32>
    %20 = vector.extract_strided_slice %11 {offsets = [0, 1], sizes = [4, 1], strides = [1, 1]} : vector<4x4xf32> to vector<4x1xf32>
    %21 = vector.extract_strided_slice %10 {offsets = [1, 0], sizes = [1, 256], strides = [1, 1]} : vector<4x256xf32> to vector<1x256xf32>
    %22 = vector.broadcast %20 : vector<4x1xf32> to vector<4x256xf32>
    %23 = vector.broadcast %21 : vector<1x256xf32> to vector<4x256xf32>
    %24 = arith.mulf %22, %23 : vector<4x256xf32>
    %25 = arith.addf %19, %24 : vector<4x256xf32>
    %26 = vector.extract_strided_slice %11 {offsets = [0, 2], sizes = [4, 1], strides = [1, 1]} : vector<4x4xf32> to vector<4x1xf32>
    %27 = vector.extract_strided_slice %10 {offsets = [2, 0], sizes = [1, 256], strides = [1, 1]} : vector<4x256xf32> to vector<1x256xf32>
    %28 = vector.broadcast %26 : vector<4x1xf32> to vector<4x256xf32>
    %29 = vector.broadcast %27 : vector<1x256xf32> to vector<4x256xf32>
    %30 = arith.mulf %28, %29 : vector<4x256xf32>
    %31 = arith.addf %25, %30 : vector<4x256xf32>
    %32 = vector.extract_strided_slice %11 {offsets = [0, 3], sizes = [4, 1], strides = [1, 1]} : vector<4x4xf32> to vector<4x1xf32>
    %33 = vector.extract_strided_slice %10 {offsets = [3, 0], sizes = [1, 256], strides = [1, 1]} : vector<4x256xf32> to vector<1x256xf32>
    %34 = vector.broadcast %32 : vector<4x1xf32> to vector<4x256xf32>
    %35 = vector.broadcast %33 : vector<1x256xf32> to vector<4x256xf32>
    %36 = arith.mulf %34, %35 : vector<4x256xf32>
    %37 = arith.addf %31, %36 : vector<4x256xf32>
    %c0_11 = arith.constant 0 : index
    %c0_12 = arith.constant 0 : index
    %c0_13 = arith.constant 0 : index
    %38 = vector.load %arg7[%c0_11, %c0_12, %c0_13] : memref<1x4x256xf32, #tpu.memory_space<vmem>>, vector<1x4x256xf32>
    %39 = vector.shape_cast %38 : vector<1x4x256xf32> to vector<4x256xf32>
    %40 = vector.shape_cast %37 : vector<4x256xf32> to vector<1x4x256xf32>
    tpu.vector_store %arg7[%c0_11, %c0_12, %c0_13], %40 {strides = array<i32>} : memref<1x4x256xf32, #tpu.memory_space<vmem>>, vector<1x4x256xf32>,
    return
  }
  func.func @transform_0(%arg0: i32, %arg1: i32) -> (i32, i32, i32) {
    %c0_i32 = arith.constant 0 : i32
    %c0_i32_0 = arith.constant 0 : i32
    return %arg0, %c0_i32, %arg1 : i32, i32, i32
  }
  func.func @transform_1(%arg0: i32, %arg1: i32) -> (i32, i32, i32) {
    %c0_i32 = arith.constant 0 : i32
    %c0_i32_0 = arith.constant 0 : i32
    return %arg0, %c0_i32, %arg1 : i32, i32, i32
  }
  func.func @transform_2(%arg0: i32, %arg1: i32) -> (i32, i32) {
    %c0_i32 = arith.constant 0 : i32
    %c0_i32_0 = arith.constant 0 : i32
    return %c0_i32, %arg1 : i32, i32
  }
  func.func @transform_3(%arg0: i32, %arg1: i32) -> (i32, i32) {
    %c0_i32 = arith.constant 0 : i32
    %c0_i32_0 = arith.constant 0 : i32
    %c0_i32_1 = arith.constant 0 : i32
    return %c0_i32, %c0_i32_0 : i32, i32
  }
  func.func @transform_4(%arg0: i32, %arg1: i32) -> (i32, i32) {
    %c0_i32 = arith.constant 0 : i32
    %c0_i32_0 = arith.constant 0 : i32
    %c0_i32_1 = arith.constant 0 : i32
    return %c0_i32, %c0_i32_0 : i32, i32
  }
  func.func @transform_5(%arg0: i32, %arg1: i32) -> (i32, i32, i32) {
    %c0_i32 = arith.constant 0 : i32
    %c0_i32_0 = arith.constant 0 : i32
    return %arg0, %c0_i32, %arg1 : i32, i32, i32
  }
}

</mosaic_0001>

<bundles_post_ra>
// kernel: freup_areadinterpolation_v2.2
= control target key start
LH: loop header
LB: loop body
LE: loop exit
PB: predicated region body
PF: predicated region fallthrough
CT: control target
= control target key end

     0   :  { %s1286_s21 = smov 0   ;;  %s1288_s22 = smov 0   ;;  %s1425_s0 = inlined_call_operand.vmem [shape: f32[2,4,256], index: 0, kind: input, shape index: {}]   ;;  %s1426_s1 = inlined_call_operand.vmem [shape: f32[2,4,256], index: 1, kind: input, shape index: {}]   ;;  %s1427_s2 = inlined_call_operand.vmem [shape: f32[2,4,256], index: 2, kind: input, shape index: {}]   ;;  %s1428_s3 = inlined_call_operand.vmem [shape: f32[4,4], index: 3, kind: input, shape index: {}]   ;;  %s1429_s4 = inlined_call_operand.vmem [shape: f32[4,1], index: 4, kind: input, shape index: {}]   ;;  %s1430_s5 = inlined_call_operand.vmem [shape: f32[4,4], index: 5, kind: input, shape index: {}]   ;;  %s1431_s6 = inlined_call_operand.vmem [shape: f32[4,1], index: 6, kind: input, shape index: {}]   ;;  %s1432_s7 = inlined_call_operand.vmem [shape: f32[4,4], index: 7, kind: input, shape index: {}]   ;;  %s1433_s8 = inlined_call_operand.vmem [shape: f32[4,1], index: 8, kind: input, shape index: {}]   ;;  %s1434_s9 = inlined_call_operand.vmem [shape: f32[4,4], index: 9, kind: input, shape index: {}]   ;;  %s1435_s10 = inlined_call_operand.vmem [shape: f32[4,1], index: 10, kind: input, shape index: {}]   ;;  %s1436_s11 = inlined_call_operand.vmem [shape: f32[2,4,256], index: 11, kind: output, shape index: {0}]   ;;  %s1437_s12 = inlined_call_operand.vmem [shape: f32[2,4,256], index: 12, kind: output, shape index: {1}]  }
   0x1   :  { %s1290_s23 = smov 0  }
   0x2 LB: > { %s35_s24 = sadd.s32 1, %s1211_s22  ;;  %p1131_p0 = scmp.ge.s32.totalorder %s1215_s23, 1  ;;  %s1215_s23 = sphi %s1290_s23, %s23_s23   ;;  %s1211_s22 = sphi %s1288_s22, %s1439_s22   ;;  %s1207_s21 = sphi %s1286_s21, %s1438_s21  }
   0x3   : > { %p37_p1 = scmp.ge.s32.totalorder %s35_s24, 2  ;;  %p422_p2 = scmp.lt.s32.totalorder %s1215_s23, 3 }
   0x5   : > { %s1441_s24 = smov (%p37_p1, %s35_s24), 0  ;;  %p423_p3 = pnand %p1131_p0, %p422_p2 }
   0x6   : > { %p500_p4 = scmp.lt.s32.totalorder (!%p423_p3), %s1207_s21, 1 }
   0x7   : > { %426 = sbr.rel (%p423_p3) target bundleno = 197 (0xc5), region = 64 }
   0xc   : > { %v563_v0 = vld [vmem:[%s1429_s4] sm:$0xf]  ;;  %v1217_v2 = vmov 2   ;;  %v1218_v3 = vmov 0   ;;  %v1219_v5 = vmov 1   ;;  %v1220_v6 = vmov 3  }
   0xd   : > { %v562_v1 = vld [vmem:[%s1428_s3] sm:$0xf]  ;;  %1179 = vset.pattern.permute.xlu0 %v1217_v2  ;;  %1177 = vset.pattern.permute.xlu1 %v1218_v3  ;;  %s1443_s21 = smov (!%p500_p4, %s1207_s21), 1  ;;  %v570_v18 = vlaneseq }
   0xe   : > { %592 = vperm.xlu1 %1177, %v563_v0   ;;  %624 = vperm.xlu0 %1179, %v562_v1   ;;  %v758_v4 = vld [vmem:[%s1432_s7] sm:$0xf]  ;;  %s1332_s27 = sshll.u32 %s1443_s21, 3 }
   0xf   : > { %v759_v7 = vld [vmem:[%s1433_s8] sm:$0xf]  ;;  %s507_s30 = scalar_lea.vmem %s1425_s0, %s1332_s27  ;;  %s517_s15 = scalar_lea.vmem %s1426_s1, %s1332_s27  ;;  %v1342_v20 = vshrl.u32 %v570_v18, 7 }
  0x10   : > { %v682_v8 = vld [vmem:[%s1431_s6] sm:$0xf]  ;;  %s527_s17 = scalar_lea.vmem %s1427_s2, %s1332_s27  ;;  %s537_s20 = scalar_lea.vmem %s1436_s11, %s1332_s27 }
  0x11   : > { %v681_v9 = vld [vmem:[%s1430_s5] sm:$0xf]  ;;  %v1345_v23 = vsub.s32 0, %v1342_v20  ;;  %v576_v24 = vsub.s32 4, %v1342_v20  ;;  %v1349_v28 = vsub.s32 1, %v1342_v20  ;;  %v607_v29 = vsub.s32 5, %v1342_v20  ;;  %s547_s28 = scalar_lea.vmem %s1437_s12, %s1332_s27 }
  0x12   : > { %1178 = vset.pattern.permute.xlu1 %v1219_v5  ;;  %1182 = vset.pattern.permute.xlu0 %v1220_v6  ;;  %v877_v10 = vld [vmem:[%s1434_s9] sm:$0xf]  ;;  %v1358_v32 = vsub.s32 2, %v1342_v20  ;;  %v633_v33 = vsub.s32 6, %v1342_v20  ;;  %v1366_v41 = vsub.s32 3, %v1342_v20  ;;  %v659_v42 = vsub.s32 7, %v1342_v20 }
  0x13   : > { %846 = vperm.xlu0 %1182, %v758_v4   ;;  %598 = vperm.xlu1 %1178, %v562_v1   ;;  %v878_v11 = vld [vmem:[%s1435_s10] sm:$0xf] }
  0x14   : > { %v549_v12 = vld [vmem:[%s507_s30] sm:$0xff] }
  0x15   : > { %v550_v13 = vld [vmem:[%s517_s15] sm:$0xff]  ;;  %v552_v14 = vmul.f32 %v549_v12, %v549_v12 }
  0x16   : > { %v553_v15 = vmul.f32 %v550_v13, %v550_v13  ;;  %v551_v36 = vld [vmem:[%s527_s17] sm:$0xff] }
  0x17   : > { %1183 = vset.pattern.permute.xlu0 %v1218_v3  ;;  %794 = vperm.xlu1 %1178, %v758_v4   ;;  %v769_v39 = vrot.slane %v551_v36, %v1345_v23  ;;  %v773_v40 = vrot.slane %v551_v36, %v576_v24  ;;  %v800_v48 = vrot.slane %v551_v36, %v1349_v28 }
  0x18   : > { %566 = vperm.xlu0 %1183, %v562_v1   ;;  %v554_v16 = vadd.f32 %v553_v15, %v552_v14  ;;  %v804_v49 = vrot.slane %v551_v36, %v607_v29  ;;  %v826_v0 = vrot.slane %v551_v36, %v1358_v32  ;;  %v852_v15 = vrot.slane %v551_v36, %v1366_v41 }
  0x19   : > { %v779_v53 = vrot.slane %v769_v39, %v1345_v23  ;;  %v783_v54 = vrot.slane %v773_v40, %v1345_v23  ;;  %v810_v61 = vrot.slane %v800_v48, %v1349_v28 }
  0x1a   : > { %1191 = vrsqrt.f32 %v554_v16  ;;  %vm557_vm0 = vcmp.eq.f32.partialorder %v554_v16, inf  ;;  %v560_v21 = vand.u32 2147483648, %v554_v16  ;;  %vm559_vm1 = vcmp.eq.f32.partialorder %v554_v16, 0.0 }
  0x1b   : > { %1180 = vset.pattern.permute.xlu1 %v1217_v2 }
  0x1c   : > { %762 = vperm.xlu0 %1183, %v758_v4   ;;  %820 = vperm.xlu1 %1180, %v758_v4  }
  0x20   : > { %788 = vperm.xlu0 %1183, %v759_v7   ;;  %1181 = vset.pattern.permute.xlu1 %v1220_v6 }
  0x21   : > { %650 = vperm.xlu1 %1181, %v562_v1  }
  0x24   : > { %700 = vperm.xlu0 %1183, %v682_v8  }
  0x25   : > { %1184 = vset.pattern.permute.xlu1 %v1218_v3 }
  0x26   : > { %685 = vperm.xlu1 %1184, %v681_v9  }
  0x27   : > { %v1192_v17 = vpop.eup %1191 }
  0x28   : > { %1187 = vset.pattern.permute.xlu0 %v1219_v5  ;;  %v556_v19 = vmul.f32 %v1192_v17, %v554_v16  ;;  %v836_v17 = vrot.slane %v826_v0, %v1358_v32 }
  0x29   : > { %902 = vperm.xlu0 %1187, %v877_v10  }
  0x2a   : > { %881 = vperm.xlu1 %1184, %v877_v10   ;;  %v558_v22 = vsel %vm557_vm0, %v554_v16, %v556_v19  ;;  %v856_v16 = vrot.slane %v551_v36, %v659_v42 }
  0x2b   : > { %v561_v27 = vsel %vm559_vm1, %v560_v21, %v558_v22 }
  0x2c   : > { %v573_v30 = vrot.slane %v561_v27, %v1345_v23  ;;  %v577_v31 = vrot.slane %v561_v27, %v576_v24  ;;  %v604_v37 = vrot.slane %v561_v27, %v1349_v28  ;;  %v608_v38 = vrot.slane %v561_v27, %v607_v29 }
  0x2d   : > { %1189 = vset.pattern.permute.xlu0 %v1220_v6  ;;  %v630_v45 = vrot.slane %v561_v27, %v1358_v32  ;;  %v634_v46 = vrot.slane %v561_v27, %v633_v33  ;;  %v656_v57 = vrot.slane %v561_v27, %v1366_v41  ;;  %v660_v58 = vrot.slane %v561_v27, %v659_v42 }
  0x2e   : > { %738 = vperm.xlu0 %1189, %v681_v9   ;;  %1185 = vset.pattern.permute.xlu1 %v1219_v5  ;;  %v583_v43 = vrot.slane %v573_v30, %v1345_v23  ;;  %v587_v44 = vrot.slane %v577_v31, %v1345_v23  ;;  %v614_v50 = vrot.slane %v604_v37, %v1349_v28 }
  0x2f   : > { %706 = vperm.xlu1 %1185, %v681_v9   ;;  %v618_v51 = vrot.slane %v608_v38, %v1349_v28  ;;  %v640_v59 = vrot.slane %v630_v45, %v1358_v32  ;;  %v644_v60 = vrot.slane %v634_v46, %v1358_v32  ;;  %v866_v38 = vrot.slane %v856_v16, %v1366_v41 }
  0x33   : > { %1186 = vset.pattern.permute.xlu1 %v1218_v3  ;;  %v814_v3 = vrot.slane %v804_v49, %v1349_v28 }
  0x34   : > { %896 = vperm.xlu1 %1186, %v878_v11  }
  0x38   : > { %1188 = vset.pattern.permute.xlu1 %v1217_v2 }
  0x39   : > { %722 = vperm.xlu1 %1188, %v681_v9   ;;  %v666_v9 = vrot.slane %v656_v57, %v1366_v41 }
  0x3d   : > { %918 = vperm.xlu1 %1188, %v877_v10  }
  0x41   : > { %1190 = vset.pattern.permute.xlu1 %v1220_v6  ;;  %v830_v6 = vrot.slane %v551_v36, %v633_v33  ;;  %v862_v36 = vrot.slane %v852_v15, %v1366_v41 }
  0x42   : > { %934 = vperm.xlu1 %1190, %v877_v10   ;;  %v670_v10 = vrot.slane %v660_v58, %v1366_v41 }
  0x43   : > { %v840_v18 = vrot.slane %v830_v6, %v1358_v32 }
  0x89   : > { %v593_v25 = vpop.permute.xlu1 %592  ;;  %v625_v26 = vpop.permute.xlu0 %624 }
  0x8a   : > { %v645_v11 = vmul.f32 %v640_v59, %v625_v26  ;;  %v646_v12 = vmul.f32 %v644_v60, %v625_v26 }
  0x8e   : > { %v599_v34 = vpop.permute.xlu1 %598  ;;  %v1361_v35 = vpop.permute.xlu0 %846 }
  0x8f   : > { %v619_v1 = vmul.f32 %v614_v50, %v599_v34  ;;  %v620_v2 = vmul.f32 %v618_v51, %v599_v34  ;;  %v868_v48 = vmul.f32 %v866_v38, %v1361_v35 }
  0x92   : > { %v795_v47 = vpop.permute.xlu1 %794 }
  0x93   : > { %v567_v52 = vpop.permute.xlu0 %566  ;;  %v815_v20 = vmul.f32 %v810_v61, %v795_v47  ;;  %v816_v21 = vmul.f32 %v814_v3, %v795_v47  ;;  %v867_v47 = vmul.f32 %v862_v36, %v1361_v35 }
  0x94   : > { %v588_v55 = vmul.f32 %v583_v43, %v567_v52  ;;  %v589_v56 = vmul.f32 %v587_v44, %v567_v52 }
  0x96   : > { %v595_v62 = vadd.f32 %v593_v25, %v588_v55  ;;  %v596_v63 = vadd.f32 %v593_v25, %v589_v56 }
  0x97   : > { %v763_v4 = vpop.permute.xlu0 %762  ;;  %v821_v5 = vpop.permute.xlu1 %820 }
  0x98   : > { %v784_v7 = vmul.f32 %v779_v53, %v763_v4  ;;  %v785_v8 = vmul.f32 %v783_v54, %v763_v4  ;;  %v621_v13 = vadd.f32 %v619_v1, %v595_v62  ;;  %v622_v14 = vadd.f32 %v620_v2, %v596_v63 }
  0x99   : > { %v841_v39 = vmul.f32 %v836_v17, %v821_v5  ;;  %v842_v40 = vmul.f32 %v840_v18, %v821_v5 }
  0x9a   : > { %v647_v27 = vadd.f32 %v645_v11, %v621_v13  ;;  %v648_v29 = vadd.f32 %v646_v12, %v622_v14 }
  0x9b   : > { %v789_v19 = vpop.permute.xlu0 %788 }
  0x9c   : > { %v791_v22 = vadd.f32 %v789_v19, %v784_v7  ;;  %v792_v24 = vadd.f32 %v789_v19, %v785_v8  ;;  %v651_v25 = vpop.permute.xlu1 %650 }
  0x9d   : > { %v671_v30 = vmul.f32 %v666_v9, %v651_v25  ;;  %v672_v31 = vmul.f32 %v670_v10, %v651_v25 }
  0x9e   : > { %v817_v26 = vadd.f32 %v815_v20, %v791_v22  ;;  %v818_v33 = vadd.f32 %v816_v21, %v792_v24 }
  0x9f   : > { %v673_v34 = vadd.f32 %v671_v30, %v647_v27  ;;  %v674_v37 = vadd.f32 %v672_v31, %v648_v29  ;;  %v701_v54 = vpop.permute.xlu0 %700 }
  0xa0   : > { %v843_v43 = vadd.f32 %v841_v39, %v817_v26  ;;  %v844_v44 = vadd.f32 %v842_v40, %v818_v33 }
  0xa1   : > { %v686_v42 = vpop.permute.xlu1 %685  ;;  %v677_v45 = vmul.f32 0.1, %v673_v34  ;;  %v678_v46 = vmul.f32 0.1, %v674_v37  ;;  %vm675_vm2 = vcmp.ge.f32.partialorder %v673_v34, 0.0  ;;  %vm676_vm3 = vcmp.ge.f32.partialorder %v674_v37, 0.0 }
  0xa2   : > { %v869_v50 = vadd.f32 %v867_v47, %v843_v43  ;;  %v870_v51 = vadd.f32 %v868_v48, %v844_v44 }
  0xa3   : > { %v679_v52 = vsel %vm675_vm2, %v673_v34, %v677_v45  ;;  %v680_v53 = vsel %vm676_vm3, %v674_v37, %v678_v46 }
  0xa4   : > { %v691_v55 = vrot.slane %v679_v52, %v1345_v23  ;;  %v695_v56 = vrot.slane %v680_v53, %v1345_v23  ;;  %v873_v58 = vmul.f32 0.1, %v869_v50  ;;  %v874_v59 = vmul.f32 0.1, %v870_v51  ;;  %v903_v62 = vpop.permute.xlu0 %902 }
  0xa5   : > { %v882_v49 = vpop.permute.xlu1 %881  ;;  %vm871_vm4 = vcmp.ge.f32.partialorder %v869_v50, 0.0  ;;  %vm872_vm5 = vcmp.ge.f32.partialorder %v870_v51, 0.0  ;;  %v712_v0 = vrot.slane %v679_v52, %v1349_v28  ;;  %v716_v1 = vrot.slane %v680_v53, %v1349_v28 }
  0xa6   : > { %v696_v60 = vmul.f32 %v691_v55, %v686_v42  ;;  %v697_v61 = vmul.f32 %v695_v56, %v686_v42  ;;  %v875_v63 = vsel %vm871_vm4, %v869_v50, %v873_v58  ;;  %v876_v35 = vsel %vm872_vm5, %v870_v51, %v874_v59 }
  0xa7   : > { %v887_v5 = vrot.slane %v875_v63, %v1345_v23  ;;  %v891_v6 = vrot.slane %v876_v35, %v1345_v23  ;;  %v728_v9 = vrot.slane %v679_v52, %v1358_v32  ;;  %v732_v10 = vrot.slane %v680_v53, %v1358_v32 }
  0xa8   : > { %v703_v7 = vadd.f32 %v701_v54, %v696_v60  ;;  %v704_v8 = vadd.f32 %v701_v54, %v697_v61  ;;  %v744_v12 = vrot.slane %v679_v52, %v1366_v41  ;;  %v748_v13 = vrot.slane %v680_v53, %v1366_v41 }
  0xa9   : > { %v739_v11 = vpop.permute.xlu0 %738  ;;  %v908_v19 = vrot.slane %v875_v63, %v1349_v28  ;;  %v912_v23 = vrot.slane %v876_v35, %v1349_v28  ;;  %v892_v20 = vmul.f32 %v887_v5, %v882_v49  ;;  %v893_v21 = vmul.f32 %v891_v6, %v882_v49 }
  0xaa   : > { %v707_v57 = vpop.permute.xlu1 %706  ;;  %v749_v22 = vmul.f32 %v744_v12, %v739_v11  ;;  %v750_v24 = vmul.f32 %v748_v13, %v739_v11  ;;  %v924_v26 = vrot.slane %v875_v63, %v1358_v32  ;;  %v928_v33 = vrot.slane %v876_v35, %v1358_v32 }
  0xab   : > { %v717_v3 = vmul.f32 %v712_v0, %v707_v57  ;;  %v718_v4 = vmul.f32 %v716_v1, %v707_v57  ;;  %v913_v36 = vmul.f32 %v908_v19, %v903_v62  ;;  %v914_v38 = vmul.f32 %v912_v23, %v903_v62 }
  0xac   : > { %v940_v44 = vrot.slane %v875_v63, %v1366_v41  ;;  %v944_v45 = vrot.slane %v876_v35, %v1366_v41 }
  0xad   : > { %v719_v15 = vadd.f32 %v717_v3, %v703_v7  ;;  %v720_v16 = vadd.f32 %v718_v4, %v704_v8 }
  0xaf   : > { %v897_v2 = vpop.permute.xlu1 %896 }
  0xb0   : > { %v899_v29 = vadd.f32 %v897_v2, %v892_v20  ;;  %v900_v30 = vadd.f32 %v897_v2, %v893_v21 }
  0xb2   : > { %v915_v42 = vadd.f32 %v913_v36, %v899_v29  ;;  %v916_v43 = vadd.f32 %v914_v38, %v900_v30 }
  0xb4   : > { %v723_v14 = vpop.permute.xlu1 %722 }
  0xb5   : > { %v733_v17 = vmul.f32 %v728_v9, %v723_v14  ;;  %v734_v18 = vmul.f32 %v732_v10, %v723_v14 }
  0xb7   : > { %v735_v25 = vadd.f32 %v733_v17, %v719_v15  ;;  %v736_v27 = vadd.f32 %v734_v18, %v720_v16 }
  0xb8   : > { %v919_v31 = vpop.permute.xlu1 %918 }
  0xb9   : > { %v751_v34 = vadd.f32 %v749_v22, %v735_v25  ;;  %v752_v37 = vadd.f32 %v750_v24, %v736_v27  ;;  %v929_v28 = vmul.f32 %v924_v26, %v919_v31  ;;  %v930_v39 = vmul.f32 %v928_v33, %v919_v31 }
  0xbb   : > { %v755_v40 = vcombine.low %v751_v34, %v752_v37  ;;  %v931_v46 = vadd.f32 %v929_v28, %v915_v42  ;;  %v932_v47 = vadd.f32 %v930_v39, %v916_v43 }
  0xbd   : > { %757 = vst [vmem:[%s537_s20] sm:$0xff] %v755_v40  ;;  %v935_v32 = vpop.permute.xlu1 %934 }
  0xbe   : > { %v945_v48 = vmul.f32 %v940_v44, %v935_v32  ;;  %v946_v49 = vmul.f32 %v944_v45, %v935_v32 }
  0xc0   : > { %v947_v50 = vadd.f32 %v945_v48, %v931_v46  ;;  %v948_v51 = vadd.f32 %v946_v49, %v932_v47 }
  0xc2   : > { %v951_v52 = vcombine.low %v947_v50, %v948_v51 }
  0xc4   : > { %953 = vst [vmem:[%s547_s28] sm:$0xff] %v951_v52 }
  0xc5 PF: > { %s23_s23 = sadd.s32 1, %s1215_s23   ;;  %s1438_s21 = smov %s1211_s22 }
  0xc6   : > { %p20_p5 = scmp.ge.s32.totalorder %s23_s23, 4   ;;  %s1439_s22 = smov %s1441_s24 }
  0xc8   :  { %22 = sbr.rel (!%p20_p5) target bundleno = 2 (0x2), region = 112 }

// kernel: freup_areadinterpolation_v2.3
= control target key start
LH: loop header
LB: loop body
LE: loop exit
PB: predicated region body
PF: predicated region fallthrough
CT: control target
= control target key end

     0   :  { %s688_s18 = smov 0   ;;  %s690_s19 = smov 0   ;;  %s738_s0 = inlined_call_operand.vmem [shape: f32[2,4,256], index: 0, kind: input, shape index: {}]   ;;  %s739_s1 = inlined_call_operand.vmem [shape: f32[2,4,256], index: 1, kind: input, shape index: {}]   ;;  %s740_s2 = inlined_call_operand.vmem [shape: f32[1,256], index: 2, kind: input, shape index: {}]   ;;  %s741_s3 = inlined_call_operand.vmem [shape: f32[4,4], index: 3, kind: input, shape index: {}]   ;;  %s742_s4 = inlined_call_operand.vmem [shape: f32[4,1], index: 4, kind: input, shape index: {}]   ;;  %s743_s5 = inlined_call_operand.vmem [shape: f32[2,4,256], index: 5, kind: output, shape index: {}]  }
   0x1   :  { %s692_s20 = smov 0  }
   0x2 LB: > { %s27_s21 = sadd.s32 1, %s648_s19  ;;  %p584_p0 = scmp.ge.s32.totalorder %s652_s20, 1  ;;  %s652_s20 = sphi %s692_s20, %s15_s20   ;;  %s648_s19 = sphi %s690_s19, %s745_s19   ;;  %s644_s18 = sphi %s688_s18, %s744_s18  }
   0x3   : > { %p29_p1 = scmp.ge.s32.totalorder %s27_s21, 2  ;;  %p235_p2 = scmp.lt.s32.totalorder %s652_s20, 3 }
   0x5   : > { %s747_s21 = smov (%p29_p1, %s27_s21), 0  ;;  %p236_p3 = pnand %p584_p0, %p235_p2 }
   0x6   : > { %p285_p4 = scmp.lt.s32.totalorder (!%p236_p3), %s644_s18, 1 }
   0x7   : > { %239 = sbr.rel (%p236_p3) target bundleno = 154 (0x9a), region = 40 }
   0xc   : > { %v344_v0 = vld [vmem:[%s741_s3] sm:$0xf]  ;;  %v654_v1 = vmov 0   ;;  %v655_v2 = vmov 1   ;;  %v656_v4 = vmov 2   ;;  %v657_v5 = vmov 3  }
   0xd   : > { %624 = vset.pattern.permute.xlu0 %v654_v1  ;;  %625 = vset.pattern.permute.xlu1 %v655_v2  ;;  %v345_v3 = vld [vmem:[%s742_s4] sm:$0xf]  ;;  %s749_s18 = smov (!%p285_p4, %s644_s18), 1  ;;  %v333_v11 = vlaneseq }
   0xe   : > { %348 = vperm.xlu0 %624, %v344_v0   ;;  %380 = vperm.xlu1 %625, %v344_v0   ;;  %s712_s26 = sshll.u32 %s749_s18, 3  ;;  %v331_v16 = vld [vmem:[%s740_s2] sm:$0x3] }
   0xf   : > { %s292_s29 = scalar_lea.vmem %s738_s0, %s712_s26  ;;  %s302_s7 = scalar_lea.vmem %s739_s1, %s712_s26  ;;  %v334_v12 = vshrl.u32 %v333_v11, 7 }
  0x10   : > { %v319_v6 = vld [vmem:[%s292_s29] sm:$0xff]  ;;  %s317_s12 = scalar_lea.vmem %s743_s5, %s712_s26 }
  0x11   : > { %v320_v7 = vld [vmem:[%s302_s7] sm:$0xff]  ;;  %v321_v8 = vmul.f32 %v319_v6, %v319_v6  ;;  %v335_v14 = vsub.s32 0, %v334_v12  ;;  %v339_v15 = vsub.s32 1, %v334_v12  ;;  %v358_v25 = vsub.s32 4, %v334_v12 }
  0x12   : > { %374 = vperm.xlu0 %624, %v345_v3   ;;  %626 = vset.pattern.permute.xlu1 %v656_v4  ;;  %v322_v9 = vmul.f32 %v320_v7, %v320_v7  ;;  %v389_v26 = vsub.s32 5, %v334_v12  ;;  %v411_v27 = vsub.s32 2, %v334_v12  ;;  %v415_v28 = vsub.s32 6, %v334_v12 }
  0x13   : > { %406 = vperm.xlu1 %626, %v344_v0   ;;  %v336_v18 = vrot.slane %v331_v16, %v335_v14  ;;  %v340_v19 = vrot.slane %v331_v16, %v339_v15  ;;  %v437_v35 = vsub.s32 3, %v334_v12  ;;  %v441_v36 = vsub.s32 7, %v334_v12 }
  0x14   : > { %v323_v10 = vadd.f32 %v322_v9, %v321_v8 }
  0x15   : > { %v341_v22 = vcombine.low %v336_v18, %v340_v19 }
  0x16   : > { %627 = vset.pattern.permute.xlu0 %v657_v5  ;;  %628 = vrsqrt.f32 %v323_v10  ;;  %vm326_vm0 = vcmp.eq.f32.partialorder %v323_v10, inf  ;;  %v329_v20 = vand.u32 2147483648, %v323_v10  ;;  %vm328_vm1 = vcmp.eq.f32.partialorder %v323_v10, 0.0 }
  0x17   : > { %432 = vperm.xlu0 %627, %v344_v0  }
  0x23   : > { %v629_v13 = vpop.eup %628 }
  0x24   : > { %v325_v17 = vmul.f32 %v629_v13, %v323_v10 }
  0x26   : > { %v327_v21 = vsel %vm326_vm0, %v323_v10, %v325_v17 }
  0x27   : > { %v330_v23 = vsel %vm328_vm1, %v329_v20, %v327_v21 }
  0x28   : > { %v343_v24 = vmul.f32 %v341_v22, %v330_v23 }
  0x2a   : > { %v355_v29 = vrot.slane %v343_v24, %v335_v14  ;;  %v359_v30 = vrot.slane %v343_v24, %v358_v25  ;;  %v386_v31 = vrot.slane %v343_v24, %v339_v15  ;;  %v390_v32 = vrot.slane %v343_v24, %v389_v26 }
  0x2b   : > { %v412_v33 = vrot.slane %v343_v24, %v411_v27  ;;  %v416_v34 = vrot.slane %v343_v24, %v415_v28  ;;  %v438_v45 = vrot.slane %v343_v24, %v437_v35  ;;  %v442_v46 = vrot.slane %v343_v24, %v441_v36 }
  0x2c   : > { %v365_v37 = vrot.slane %v355_v29, %v335_v14  ;;  %v369_v38 = vrot.slane %v359_v30, %v335_v14  ;;  %v396_v41 = vrot.slane %v386_v31, %v339_v15  ;;  %v400_v42 = vrot.slane %v390_v32, %v339_v15 }
  0x2d   : > { %v422_v43 = vrot.slane %v412_v33, %v411_v27  ;;  %v426_v44 = vrot.slane %v416_v34, %v411_v27  ;;  %v448_v57 = vrot.slane %v438_v45, %v437_v35  ;;  %v452_v58 = vrot.slane %v442_v46, %v437_v35 }
  0x89   : > { %v349_v39 = vpop.permute.xlu0 %348  ;;  %v381_v40 = vpop.permute.xlu1 %380 }
  0x8a   : > { %v370_v47 = vmul.f32 %v365_v37, %v349_v39  ;;  %v371_v48 = vmul.f32 %v369_v38, %v349_v39  ;;  %v401_v50 = vmul.f32 %v396_v41, %v381_v40  ;;  %v402_v51 = vmul.f32 %v400_v42, %v381_v40 }
  0x8d   : > { %v375_v49 = vpop.permute.xlu0 %374 }
  0x8e   : > { %v377_v52 = vadd.f32 %v375_v49, %v370_v47  ;;  %v378_v53 = vadd.f32 %v375_v49, %v371_v48  ;;  %v407_v54 = vpop.permute.xlu1 %406 }
  0x8f   : > { %v427_v55 = vmul.f32 %v422_v43, %v407_v54  ;;  %v428_v56 = vmul.f32 %v426_v44, %v407_v54 }
  0x90   : > { %v403_v59 = vadd.f32 %v401_v50, %v377_v52  ;;  %v404_v60 = vadd.f32 %v402_v51, %v378_v53 }
  0x92   : > { %v429_v61 = vadd.f32 %v427_v55, %v403_v59  ;;  %v430_v62 = vadd.f32 %v428_v56, %v404_v60  ;;  %v433_v63 = vpop.permute.xlu0 %432 }
  0x93   : > { %v453_v0 = vmul.f32 %v448_v57, %v433_v63  ;;  %v454_v1 = vmul.f32 %v452_v58, %v433_v63 }
  0x95   : > { %v455_v2 = vadd.f32 %v453_v0, %v429_v61  ;;  %v456_v3 = vadd.f32 %v454_v1, %v430_v62 }
  0x97   : > { %v459_v4 = vcombine.low %v455_v2, %v456_v3 }
  0x99   : > { %461 = vst [vmem:[%s317_s12] sm:$0xff] %v459_v4 }
  0x9a PF: > { %s15_s20 = sadd.s32 1, %s652_s20   ;;  %s744_s18 = smov %s648_s19 }
  0x9b   : > { %p12_p5 = scmp.ge.s32.totalorder %s15_s20, 4   ;;  %s745_s19 = smov %s747_s21 }
  0x9d   :  { %14 = sbr.rel (!%p12_p5) target bundleno = 2 (0x2), region = 76 }

</bundles_post_ra>
